<compile_context>
chip_gen: v5e
topology: v5e:2x2
jax: 0.10.0
libtpu: 0.0.40
codegen_flags: <defaults>
</compile_context>

<pallas_src>
import functools

import numpy as np
import jax
import jax.numpy as jnp
from jax import lax
from jax.experimental import pallas as pl
from jax.experimental.pallas import tpu as pltpu

K = 5
STRIDE = 2
PAD = 2
OUT_PAD = 1
EPS = 1e-5

# Per output phase (oh % 2): (kernel tap index kh, input row offset dh) such that
# out[2*y + phase] += x[y + dh] * W[kh].  Same table applies to the width dimension.
_TAPS = (
    ((0, 1), (2, 0), (4, -1)),   # even output phase: 3 taps
    ((1, 1), (3, 0)),            # odd output phase:  2 taps
)
_SHIFTS = (1, 0, -1)             # distinct input offsets used by either phase

# Static tap-selection matrix sel[phase, shift_idx, tap] in {0, 1}.
_SEL = np.zeros((2, len(_SHIFTS), K), np.float32)
for _ph, _taps in enumerate(_TAPS):
    for _k, _d in _taps:
        _SEL[_ph, _SHIFTS.index(_d), _k] = 1.0


def _round_up(x, m):
    return (x + m - 1) // m * m


def _conv_stats_kernel(p_ref, w_ref, out_ref, stats_ref, *, total):
    """One block-structured MXU matmul + lane-dense per-block BN statistics.

    p_ref    : (9*Cin, LB)       bf16  9 shifted copies of the raw input block
    w_ref    : (4*Cout, 9*Cin)   bf16  merged polyphase weight (grid-resident)
    out_ref  : (4*Cout, LB)      bf16  conv output, rows ordered (phase, channel)
    stats_ref: (1, 8*Cout, 128)  f32   rows [0:4*Cout]  = per-row sums S
                                       rows [4*Cout:]   = shifted 2nd moments Q
    """
    y = jnp.dot(w_ref[...], p_ref[...], preferred_element_type=jnp.float32)
    out_ref[...] = y.astype(out_ref.dtype)

    rows, lb = y.shape
    # Column pads of the patch operand are zero, so they contribute nothing to S.
    s = jnp.sum(y, axis=1, keepdims=True)                       # (rows, 1)
    # Shifted second moment around the (approximate) per-row block mean.  The exact
    # cross-block combine happens in the wrapper; any shift is algebraically valid,
    # a near-mean shift just avoids E[x^2]-E[x]^2 cancellation.
    c = s * jnp.float32(1.0 / lb)
    n_valid = jnp.minimum(lb, total - pl.program_id(0) * lb)    # valid cols this block
    lane = lax.broadcasted_iota(jnp.int32, y.shape, 1)
    d = jnp.where(lane < n_valid, y - c, 0.0)
    q = jnp.sum(d * d, axis=1, keepdims=True)                   # (rows, 1)
    # Lane-dense stats store: full 128-lane rows -> unmasked vst, no tiny DMA.
    stats_ref[0] = jnp.broadcast_to(jnp.concatenate([s, q], axis=0), (2 * rows, 128))


def _bn_relu_kernel(y_ref, scale_ref, shift_ref, out_ref, *, act):
    """Fused per-channel affine BN (+ optional ReLU) on a (4*Cout, LB) block."""
    out = y_ref[...].astype(jnp.float32) * scale_ref[...] + shift_ref[...]
    if act:
        out = jnp.maximum(out, 0.0)
    out_ref[...] = out.astype(out_ref.dtype)


def _pick_lane_block(total, cin, cout, lane_block):
    """Largest LB fitting a conservative VMEM budget (v7x-safe) while keeping
    >= 2 grid steps so the 'parallel' axis can shard across two TensorCores."""
    total_128 = _round_up(max(total, 1), 128)
    # double-buffered bf16 in/out + ~3 block-sized f32 temporaries, per lane column
    per_col = 2 * (9 * cin) * 2 + 2 * (4 * cout) * 2 + 3 * (4 * cout) * 4
    budget = 24 * 1024 * 1024
    lb = max(128, min(lane_block, budget // per_col // 128 * 128))
    if total_128 >= 256:
        lb = min(lb, max(128, total_128 // 2 // 128 * 128))
    else:
        lb = total_128
    return lb


def decoder_layer_forward(x_nchw, weight_t, bias, gamma, beta,
                          *, act=True, bn=True, lane_block=4096):
    N, Cin, H, W = x_nchw.shape
    Cout = weight_t.shape[1]
    Ho, Wo = 2 * H, 2 * W                       # (H-1)*2 - 4 + 5 + 1 = 2H
    total = N * H * W
    rows4 = 4 * Cout
    kdim = 9 * Cin                              # merged contraction depth

    # ---- merged polyphase weight (4*Cout, 9*Cin): zeros where a phase lacks a tap ----
    sel = jnp.asarray(_SEL)
    wm = jnp.einsum("pik,qjl,cokl->pqoijc", sel, sel, weight_t.astype(jnp.float32))
    wm = wm.reshape(rows4, kdim).astype(jnp.bfloat16)

    # ---- 9 shifted bf16 views of the raw input (rows = shift-major, then Cin) ----
    xp = jnp.pad(x_nchw.astype(jnp.bfloat16), ((0, 0), (0, 0), (1, 1), (1, 1)))
    slabs = [xp[:, :, 1 + dh:1 + dh + H, 1 + dw:1 + dw + W]
             for dh in _SHIFTS for dw in _SHIFTS]
    patches = jnp.stack(slabs, axis=0)                          # (9, N, Cin, H, W)
    patches = jnp.transpose(patches, (0, 2, 1, 3, 4)).reshape(kdim, total)

    LB = _pick_lane_block(total, Cin, Cout, lane_block)
    total_pad = _round_up(total, LB)
    if total_pad != total:
        patches = jnp.pad(patches, ((0, 0), (0, total_pad - total)))
    G = total_pad // LB

    cparams = pltpu.CompilerParams(dimension_semantics=("parallel",),
                                   vmem_limit_bytes=32 * 1024 * 1024)

    # ---- pass 1: one block-structured conv matmul + per-block BN partial stats ----
    cost1 = pl.CostEstimate(
        flops=2 * rows4 * kdim * total_pad, transcendentals=0,
        bytes_accessed=(kdim * total_pad * 2 + rows4 * kdim * 2
                        + rows4 * total_pad * 2 + G * 2 * rows4 * 128 * 4))
    conv_out, stats = pl.pallas_call(
        functools.partial(_conv_stats_kernel, total=total),
        out_shape=(jax.ShapeDtypeStruct((rows4, total_pad), jnp.bfloat16),
                   jax.ShapeDtypeStruct((G, 2 * rows4, 128), jnp.float32)),
        grid_spec=pltpu.PrefetchScalarGridSpec(
            num_scalar_prefetch=0,
            grid=(G,),
            in_specs=[pl.BlockSpec((kdim, LB), lambda g: (0, g)),
                      pl.BlockSpec((rows4, kdim), lambda g: (0, 0))],
            out_specs=(pl.BlockSpec((rows4, LB), lambda g: (0, g)),
                       pl.BlockSpec((1, 2 * rows4, 128), lambda g: (g, 0, 0)))),
        compiler_params=cparams,
        cost_estimate=cost1,
    )(patches, wm)

    # ---- exact cross-block / cross-phase combine of the shifted moments (f32) ----
    if bn:
        st = stats[:, :, 0]                                     # (G, 2*rows4)
        S = st[:, :rows4].reshape(G, 4, Cout)                   # per-(block, phase, ch)
        Q = st[:, rows4:].reshape(G, 4, Cout)
        n_g = jnp.clip(total - jnp.arange(G) * LB, 0, LB).astype(jnp.float32)
        n_g = n_g[:, None, None]                                # valid cols per block
        c_g = S * jnp.float32(1.0 / LB)                         # same shift as in-kernel
        count = jnp.float32(N * Ho * Wo)                        # = 4 * total
        mean = jnp.sum(S, axis=(0, 1)) / count                  # (Cout,)
        delta = c_g - mean[None, None, :]
        d1 = S - n_g * c_g                                      # sum(y - c) per group
        var = jnp.sum(Q + 2.0 * delta * d1 + n_g * delta * delta, axis=(0, 1)) / count
        inv_std = lax.rsqrt(var + EPS)
        scale_c = gamma.astype(jnp.float32) * inv_std
        # ConvTranspose bias cancels exactly under training-mode BatchNorm.
        shift_c = beta.astype(jnp.float32) - mean * scale_c
    else:
        scale_c = jnp.ones((Cout,), jnp.float32)
        shift_c = bias.astype(jnp.float32)
    scale_col = jnp.tile(scale_c, 4)[:, None]                   # (4*Cout, 1)
    shift_col = jnp.tile(shift_c, 4)[:, None]

    # ---- pass 2: fused affine BN + ReLU, bf16 in / bf16 out (pure streaming) ----
    cost2 = pl.CostEstimate(
        flops=3 * rows4 * total_pad, transcendentals=0,
        bytes_accessed=2 * rows4 * total_pad * 2 + 2 * rows4 * 4)
    out_bn = pl.pallas_call(
        functools.partial(_bn_relu_kernel, act=act),
        out_shape=jax.ShapeDtypeStruct((rows4, total_pad), jnp.bfloat16),
        grid_spec=pltpu.PrefetchScalarGridSpec(
            num_scalar_prefetch=0,
            grid=(G,),
            in_specs=[pl.BlockSpec((rows4, LB), lambda g: (0, g)),
                      pl.BlockSpec((rows4, 1), lambda g: (0, 0)),
                      pl.BlockSpec((rows4, 1), lambda g: (0, 0))],
            out_specs=pl.BlockSpec((rows4, LB), lambda g: (0, g))),
        compiler_params=cparams,
        cost_estimate=cost2,
    )(conv_out, scale_col, shift_col)

    # ---- interleave the 4 phases (in bf16; f32 cast fuses with the transpose) ----
    # TODO(synk): interleave the W phases in-kernel via u32 lane packing to drop this
    # wrapper transpose entirely.
    o = out_bn[:, :total].reshape(2, 2, Cout, N, H, W)          # [ph, pw, c, n, y, x]
    o = jnp.transpose(o, (3, 2, 4, 0, 5, 1)).astype(jnp.float32)
    return o.reshape(N, Cout, Ho, Wo)


def _reference(x_nchw, weight_t, bias, gamma, beta):
    """Pure-JAX f32 reference of the PyTorch forward (training-mode BN)."""
    x = jnp.transpose(x_nchw, (0, 2, 3, 1)).astype(jnp.float32)
    w_hwio = jnp.transpose(weight_t[:, :, ::-1, ::-1], (2, 3, 0, 1))  # (k,k,Cin,Cout)
    lo = K - 1 - PAD
    hi = K - 1 - PAD + OUT_PAD
    y = lax.conv_general_dilated(
        x, w_hwio.astype(jnp.float32), window_strides=(1, 1),
        padding=[(lo, hi), (lo, hi)], lhs_dilation=(STRIDE, STRIDE),
        dimension_numbers=("NHWC", "HWIO", "NHWC"))
    y = y + bias[None, None, None, :]
    mean = jnp.mean(y, axis=(0, 1, 2), keepdims=True)
    var = jnp.mean((y - mean) ** 2, axis=(0, 1, 2), keepdims=True)
    y = (y - mean) * lax.rsqrt(var + EPS) * gamma[None, None, None, :] \
        + beta[None, None, None, :]
    y = jnp.maximum(y, 0.0)
    return jnp.transpose(y, (0, 3, 1, 2))


if __name__ == "__main__":
    N, Cin, Cout, H, W = 2, 4, 8, 16, 16

    key = jax.random.PRNGKey(0)
    k1, k2, k3 = jax.random.split(key, 3)
    x = jax.random.normal(k1, (N, Cin, H, W), jnp.float32)
    weight_t = jax.random.normal(k2, (Cin, Cout, K, K), jnp.float32) * 0.1
    bias = jax.random.normal(k3, (Cout,), jnp.float32) * 0.1
    gamma = jnp.ones((Cout,), jnp.float32)   # BatchNorm2d default affine init
    beta = jnp.zeros((Cout,), jnp.float32)

    fwd = jax.jit(decoder_layer_forward)
    out = jax.block_until_ready(fwd(x, weight_t, bias, gamma, beta))

    ref = _reference(x, weight_t, bias, gamma, beta)
    assert out.shape == (N, Cout, 2 * H, 2 * W), out.shape
    # bf16 MXU operands + bf16 intermediates/output -> loosened tolerance vs f32 ref.
    assert jnp.allclose(out, ref, atol=7e-2, rtol=7e-2), float(
        jnp.max(jnp.abs(out - ref)))

    print("KERNEL_OK")
</pallas_src>

<mosaic_0001>
module attributes {stable_mosaic.version = 11 : i64} {
  func.func @_conv_stats_kernel(%arg0: i32, %arg1: memref<36x256xbf16, #tpu.memory_space<vmem>>, %arg2: memref<32x36xbf16, #tpu.memory_space<vmem>>, %arg3: memref<32x256xbf16, #tpu.memory_space<vmem>>, %arg4: memref<1x64x128xf32, #tpu.memory_space<vmem>>) attributes {dimension_semantics = [#tpu.dimension_semantics<parallel>], iteration_bounds = array<i64: 2>, scalar_prefetch = 0 : i64, scratch_operands = 0 : i64, tpu.core_type = #tpu.core_type<tc>, window_params = [{transform_indices = @transform_0, window_bounds = array<i64: 36, 256>}, {pipeline_mode = #tpu.pipeline_mode<synchronous>, transform_indices = @transform_1, window_bounds = array<i64: 32, 36>}, {transform_indices = @transform_2, window_bounds = array<i64: 32, 256>}, {transform_indices = @transform_3, window_bounds = array<i64: 1, 64, 128>}]} {
    %c0 = arith.constant 0 : index
    %c0_0 = arith.constant 0 : index
    %0 = vector.load %arg2[%c0, %c0_0] : memref<32x36xbf16, #tpu.memory_space<vmem>>, vector<32x36xbf16>
    %c0_1 = arith.constant 0 : index
    %c0_2 = arith.constant 0 : index
    %1 = vector.load %arg1[%c0_1, %c0_2] : memref<36x256xbf16, #tpu.memory_space<vmem>>, vector<36x256xbf16>
    %cst = arith.constant dense<0.000000e+00> : vector<32x256xf32>
    %2 = tpu.matmul %0, %1, %cst {dimension_numbers = #tpu.dot_dimension_numbers<[1], [0], [0], [1], [0, 0, 1, 1], [], []>} : vector<32x36xbf16>, vector<36x256xbf16>, vector<32x256xf32> -> vector<32x256xf32>
    %3 = arith.truncf %2 : vector<32x256xf32> to vector<32x256xbf16>
    %c0_3 = arith.constant 0 : index
    %c0_4 = arith.constant 0 : index
    %4 = vector.load %arg3[%c0_3, %c0_4] : memref<32x256xbf16, #tpu.memory_space<vmem>>, vector<32x256xbf16>
    tpu.vector_store %arg3[%c0_3, %c0_4], %3 {strides = array<i32>} : memref<32x256xbf16, #tpu.memory_space<vmem>>, vector<32x256xbf16>,
    %cst_5 = arith.constant dense<0.000000e+00> : vector<32xf32>
    %5 = vector.multi_reduction <add>, %2, %cst_5 [1] : vector<32x256xf32> to vector<32xf32>
    %6 = vector.shape_cast %5 : vector<32xf32> to vector<32x1xf32>
    %cst_6 = arith.constant 3.906250e-03 : f32
    %7 = vector.broadcast %cst_6 : f32 to vector<32x1xf32>
    %8 = arith.mulf %6, %7 : vector<32x1xf32>
    %c256_i32 = arith.constant 256 : i32
    %9 = arith.muli %arg0, %c256_i32 : i32
    %c512_i32 = arith.constant 512 : i32
    %10 = arith.subi %c512_i32, %9 : i32
    %c256_i32_7 = arith.constant 256 : i32
    %11 = arith.minsi %c256_i32_7, %10 : i32
    %12 = tpu.iota {dimensions = array<i32: 1>} : vector<32x256xi32>
    %13 = vector.broadcast %11 : i32 to vector<32x256xi32>
    %14 = arith.cmpi slt, %12, %13 : vector<32x256xi32>
    %15 = vector.broadcast %8 : vector<32x1xf32> to vector<32x256xf32>
    %16 = arith.subf %2, %15 : vector<32x256xf32>
    %cst_8 = arith.constant 0.000000e+00 : f32
    %17 = vector.broadcast %cst_8 : f32 to vector<32x256xf32>
    %18 = arith.select %14, %16, %17 : vector<32x256xi1>, vector<32x256xf32>
    %19 = arith.mulf %18, %18 : vector<32x256xf32>
    %cst_9 = arith.constant dense<0.000000e+00> : vector<32xf32>
    %20 = vector.multi_reduction <add>, %19, %cst_9 [1] : vector<32x256xf32> to vector<32xf32>
    %21 = vector.shape_cast %20 : vector<32xf32> to vector<32x1xf32>
    %22 = tpu.concatenate %6, %21 in 0 : vector<32x1xf32>, vector<32x1xf32> -> vector<64x1xf32>
    %23 = vector.shape_cast %22 : vector<64x1xf32> to vector<64x1xf32>
    %24 = vector.broadcast %23 : vector<64x1xf32> to vector<64x128xf32>
    %c0_10 = arith.constant 0 : index
    %c0_11 = arith.constant 0 : index
    %c0_12 = arith.constant 0 : index
    %25 = vector.load %arg4[%c0_10, %c0_11, %c0_12] : memref<1x64x128xf32, #tpu.memory_space<vmem>>, vector<1x64x128xf32>
    %26 = vector.shape_cast %25 : vector<1x64x128xf32> to vector<64x128xf32>
    %27 = vector.shape_cast %24 : vector<64x128xf32> to vector<1x64x128xf32>
    tpu.vector_store %arg4[%c0_10, %c0_11, %c0_12], %27 {strides = array<i32>} : memref<1x64x128xf32, #tpu.memory_space<vmem>>, vector<1x64x128xf32>,
    return
  }
  func.func @transform_0(%arg0: i32) -> (i32, i32) {
    %c0_i32 = arith.constant 0 : i32
    %c0_i32_0 = arith.constant 0 : i32
    return %c0_i32, %arg0 : i32, i32
  }
  func.func @transform_1(%arg0: i32) -> (i32, i32) {
    %c0_i32 = arith.constant 0 : i32
    %c0_i32_0 = arith.constant 0 : i32
    %c0_i32_1 = arith.constant 0 : i32
    return %c0_i32, %c0_i32_0 : i32, i32
  }
  func.func @transform_2(%arg0: i32) -> (i32, i32) {
    %c0_i32 = arith.constant 0 : i32
    %c0_i32_0 = arith.constant 0 : i32
    return %c0_i32, %arg0 : i32, i32
  }
  func.func @transform_3(%arg0: i32) -> (i32, i32, i32) {
    %c0_i32 = arith.constant 0 : i32
    %c0_i32_0 = arith.constant 0 : i32
    %c0_i32_1 = arith.constant 0 : i32
    return %arg0, %c0_i32, %c0_i32_0 : i32, i32, i32
  }
}

module attributes {stable_mosaic.version = 11 : i64} {
  func.func @_bn_relu_kernel(%arg0: i32, %arg1: memref<32x256xbf16, #tpu.memory_space<vmem>>, %arg2: memref<32x1xf32, #tpu.memory_space<vmem>>, %arg3: memref<32x1xf32, #tpu.memory_space<vmem>>, %arg4: memref<32x256xbf16, #tpu.memory_space<vmem>>) attributes {dimension_semantics = [#tpu.dimension_semantics<parallel>], iteration_bounds = array<i64: 2>, scalar_prefetch = 0 : i64, scratch_operands = 0 : i64, tpu.core_type = #tpu.core_type<tc>, window_params = [{transform_indices = @transform_0, window_bounds = array<i64: 32, 256>}, {pipeline_mode = #tpu.pipeline_mode<synchronous>, transform_indices = @transform_1, window_bounds = array<i64: 32, 1>}, {pipeline_mode = #tpu.pipeline_mode<synchronous>, transform_indices = @transform_2, window_bounds = array<i64: 32, 1>}, {transform_indices = @transform_3, window_bounds = array<i64: 32, 256>}]} {
    %c0 = arith.constant 0 : index
    %c0_0 = arith.constant 0 : index
    %0 = vector.load %arg1[%c0, %c0_0] : memref<32x256xbf16, #tpu.memory_space<vmem>>, vector<32x256xbf16>
    %1 = arith.extf %0 : vector<32x256xbf16> to vector<32x256xf32>
    %c0_1 = arith.constant 0 : index
    %c0_2 = arith.constant 0 : index
    %2 = vector.load %arg2[%c0_1, %c0_2] : memref<32x1xf32, #tpu.memory_space<vmem>>, vector<32x1xf32>
    %3 = vector.broadcast %2 : vector<32x1xf32> to vector<32x256xf32>
    %4 = arith.mulf %1, %3 : vector<32x256xf32>
    %c0_3 = arith.constant 0 : index
    %c0_4 = arith.constant 0 : index
    %5 = vector.load %arg3[%c0_3, %c0_4] : memref<32x1xf32, #tpu.memory_space<vmem>>, vector<32x1xf32>
    %6 = vector.broadcast %5 : vector<32x1xf32> to vector<32x256xf32>
    %7 = arith.addf %4, %6 : vector<32x256xf32>
    %cst = arith.constant 0.000000e+00 : f32
    %8 = vector.broadcast %cst : f32 to vector<32x256xf32>
    %9 = arith.maximumf %7, %8 : vector<32x256xf32>
    %10 = arith.truncf %9 : vector<32x256xf32> to vector<32x256xbf16>
    %c0_5 = arith.constant 0 : index
    %c0_6 = arith.constant 0 : index
    %11 = vector.load %arg4[%c0_5, %c0_6] : memref<32x256xbf16, #tpu.memory_space<vmem>>, vector<32x256xbf16>
    tpu.vector_store %arg4[%c0_5, %c0_6], %10 {strides = array<i32>} : memref<32x256xbf16, #tpu.memory_space<vmem>>, vector<32x256xbf16>,
    return
  }
  func.func @transform_0(%arg0: i32) -> (i32, i32) {
    %c0_i32 = arith.constant 0 : i32
    %c0_i32_0 = arith.constant 0 : i32
    return %c0_i32, %arg0 : i32, i32
  }
  func.func @transform_1(%arg0: i32) -> (i32, i32) {
    %c0_i32 = arith.constant 0 : i32
    %c0_i32_0 = arith.constant 0 : i32
    %c0_i32_1 = arith.constant 0 : i32
    return %c0_i32, %c0_i32_0 : i32, i32
  }
  func.func @transform_2(%arg0: i32) -> (i32, i32) {
    %c0_i32 = arith.constant 0 : i32
    %c0_i32_0 = arith.constant 0 : i32
    %c0_i32_1 = arith.constant 0 : i32
    return %c0_i32, %c0_i32_0 : i32, i32
  }
  func.func @transform_3(%arg0: i32) -> (i32, i32) {
    %c0_i32 = arith.constant 0 : i32
    %c0_i32_0 = arith.constant 0 : i32
    return %c0_i32, %arg0 : i32, i32
  }
}

</mosaic_0001>

<bundles_post_ra>
// kernel: tile.0
= control target key start
LH: loop header
LB: loop body
LE: loop exit
PB: predicated region body
PF: predicated region fallthrough
CT: control target
= control target key end

     0   :  { %s66_s8 = smov 125   ;;  %s67_s9 = smov 123   ;;  %vm7_vm0 = vcmask 7168   ;;  %s117_s0 = inlined_call_operand.vmem [shape: f32[4,8], index: 0, kind: input, shape index: {}]   ;;  %s118_s1 = inlined_call_operand.vmem [shape: f32[32,1], index: 1, kind: output, shape index: {}]  }
   0x1   :  { %v4_v0 = vld [vmem:[%s117_s0] sm:$0xf]  ;;  %s65_s0 = smov 127   ;;  %s68_s10 = smov 126  }
   0x2   :  { %5 = vst [vmem:[#allocation0] sm:$0xf] %v4_v0  ;;  %s69_s11 = smov 124   ;;  %s70_s12 = smov 122  }
   0x3   :  { %s71_s13 = smov 121  }
   0x9   :  { %v9_v1 = vld [vmem:[#allocation0] sm:$0xf]  }
   0xa   :  { %v21_v2 = vld [vmem:[#allocation0] sm:$0xf]   ;;  %10 = vrot.lane.b32.xlu0 %v9_v1, %s65_s0 }
   0xb   :  { %22 = vrot.lane.b32.xlu1 %v21_v2, %s66_s8  ;;  %v33_v3 = vld [vmem:[#allocation0] sm:$0xf]  }
   0xc   :  { %34 = vrot.lane.b32.xlu2 %v33_v3, %s67_s9  ;;  %v15_v4 = vld [vmem:[#allocation0] sm:$0xf]  }
   0xd   :  { %v27_v5 = vld [vmem:[#allocation0] sm:$0xf]  }
   0xe   :  { %v39_v6 = vld [vmem:[#allocation0] sm:$0xf]  }
   0xf   :  { %v45_v7 = vld [vmem:[#allocation0] sm:$0xf]  }
  0x10   :  { %v6_v8 = vld [vmem:[#allocation0] sm:$0xf]  }
  0x11   :  { %8 = vst.msk [vmem:[%s118_s1] ss:$8 sm:$0xf] %vm7_vm0, %v6_v8  }
  0x12   :  { %16 = vrot.lane.b32.xlu0 %v15_v4, %s68_s10 }
  0x13   :  { %28 = vrot.lane.b32.xlu1 %v27_v5, %s69_s11 }
  0x14   :  { %40 = vrot.lane.b32.xlu2 %v39_v6, %s70_s12 }
  0x1a   :  { %46 = vrot.lane.b32.xlu0 %v45_v7, %s71_s13 }
  0x66   :  { %v35_v9 = vpop.permute.xlu2 %34  }
  0x67   :  { %55 = vst.msk [vmem:[%s118_s1 + $0x5] ss:$8 sm:$0xf] %vm7_vm0, %v35_v9  }
  0x6e   :  { %v41_v10 = vpop.permute.xlu2 %40  }
  0x6f   :  { %56 = vst.msk [vmem:[%s118_s1 + $0x6] ss:$8 sm:$0xf] %vm7_vm0, %v41_v10  }
  0x7c   :  { %v11_v11 = vpop.permute.xlu0 %10  }
  0x7d   :  { %v23_v12 = vpop.permute.xlu1 %22   ;;  %51 = vst.msk [vmem:[%s118_s1 + $0x1] ss:$8 sm:$0xf] %vm7_vm0, %v11_v11  }
  0x7e   :  { %53 = vst.msk [vmem:[%s118_s1 + $0x3] ss:$8 sm:$0xf] %vm7_vm0, %v23_v12  }
  0x84   :  { %v17_v13 = vpop.permute.xlu0 %16  }
  0x85   :  { %v29_v14 = vpop.permute.xlu1 %28   ;;  %52 = vst.msk [vmem:[%s118_s1 + $0x2] ss:$8 sm:$0xf] %vm7_vm0, %v17_v13  }
  0x86   :  { %54 = vst.msk [vmem:[%s118_s1 + $0x4] ss:$8 sm:$0xf] %vm7_vm0, %v29_v14  }
  0x8c   :  { %v47_v15 = vpop.permute.xlu0 %46  }
  0x8d   :  { %57 = vst.msk [vmem:[%s118_s1 + $0x7] ss:$8 sm:$0xf] %vm7_vm0, %v47_v15  }

// kernel: decoder_layer_forward.3
= control target key start
LH: loop header
LB: loop body
LE: loop exit
PB: predicated region body
PF: predicated region fallthrough
CT: control target
= control target key end

     0   :  { %s508_s12 = smov 0   ;;  %s510_s13 = smov 0   ;;  %s602_s0 = inlined_call_operand.vmem [shape: bf16[32,512], index: 0, kind: input, shape index: {}]   ;;  %s603_s1 = inlined_call_operand.vmem [shape: f32[32,1], index: 1, kind: input, shape index: {}]   ;;  %s604_s2 = inlined_call_operand.vmem [shape: f32[32,1], index: 2, kind: input, shape index: {}]   ;;  %s605_s3 = inlined_call_operand.vmem [shape: bf16[32,512], index: 3, kind: output, shape index: {}]  }
   0x1   :  { %s512_s14 = smov 0  }
   0x2 LB: > { %s418_s15 = sadd.s32 4294967295, %s485_s14   ;;  %s525_s16 = sadd.s32 1, %s485_s14   ;;  %s485_s14 = sphi %s512_s14, %s609_s14   ;;  %s481_s13 = sphi %s510_s13, %s608_s13   ;;  %s477_s12 = sphi %s508_s12, %s607_s12  }
   0x3   : > { %s17_s17 = ssub.s32 %s485_s14, %s525_s16  ;;  %s20_s18 = sadd.s32 1, %s481_s13 }
   0x4   : > { %p18_p0 = scmp.eq.s32.totalorder %s17_s17, 0  ;;  %p27_p1 = scmp.ne.s32.totalorder %s481_s13, %s477_s12 }
   0x5   : > { %p28_p2 = scmp.eq.s32.totalorder %s485_s14, 0  ;;  %p99_p3 = scmp.eq.s32.totalorder %s418_s15, 1 }
   0x6   : > { %s536_s19 = scalar_select %p18_p0, %s481_s13, %s20_s18  }
   0x7   : > { %p29_p4 = por %p28_p2, %p27_p1  ;;  %p538_p5 = por %p99_p3, %p27_p1 }
   0x8   : > { %p421_p6 = scmp.ge.s32.totalorder %s485_s14, 2 }
   0xa   : > { %127 = sbr.rel (%p421_p6) target bundleno = 23 (0x17), region = 24 }
   0xf   : > { %130 = sbr.rel (!%p29_p4) target bundleno = 23 (0x17), region = 28  ;;  %s132_s21 = sand.u32 (%p29_p4), 1, %s481_s13  }
  0x10   : > { %s433_s22 = sshll.u32 (%p29_p4), %s485_s14, 3  ;;  %s422_s23 = sshll.u32 (%p29_p4), %s132_s21, 5 }
  0x11   : > { %s137_s26 = scalar_lea.vmem (%p29_p4), %s602_s0, %s433_s22  ;;  %s134_s27 = scalar_lea.vmem (%p29_p4), [#allocation2], %s422_s23 }
  0x12   : > { %v172_v0 = vld [vmem:[%s137_s26] sm:$0xff] (%p29_p4)  ;;  %v174_v1 = vld [vmem:[%s137_s26 + $0x10] sm:$0xff] (%p29_p4) }
  0x13   : > { %v176_v2 = vld [vmem:[%s137_s26 + $0x20] sm:$0xff] (%p29_p4)  ;;  %173 = vst [vmem:[%s134_s27] sm:$0xff] (%p29_p4), %v172_v0  ;;  %v178_v3 = vld [vmem:[%s137_s26 + $0x30] sm:$0xff] (%p29_p4) }
  0x14   : > { %175 = vst [vmem:[%s134_s27 + $0x8] sm:$0xff] %v174_v1 }
  0x15   : > { %177 = vst [vmem:[%s134_s27 + $0x10] sm:$0xff] %v176_v2 }
  0x16   : > { %179 = vst [vmem:[%s134_s27 + $0x18] sm:$0xff] %v178_v3 }
  0x17 PF: > { %p425_p7 = scmp.ge.s32.totalorder %s485_s14, 1  ;;  %p184_p8 = scmp.lt.s32.totalorder %s485_s14, 3 }
  0x19   : > { %p185_p9 = pnand %p425_p7, %p184_p8 }
  0x1a   : > { %s191_s24 = sand.u32 (!%p185_p9), 1, %s477_s12  }
  0x1b   : > { %188 = sbr.rel (%p185_p9) target bundleno = 181 (0xb5), region = 66  ;;  %s426_s25 = sshll.u32 (!%p185_p9), %s191_s24, 5 }
  0x1c   : > { %s193_s26 = scalar_lea.vmem (!%p185_p9), [#allocation2], %s426_s25  ;;  %s575_s12 = scalar_lea.vmem (!%p185_p9), [#allocation3], %s426_s25 }
  0x20   : > { %v229_v4 = vld [vmem:[%s603_s1 + $0x10] sm:$0xff]  ;;  %v227_v5 = vld [vmem:[%s603_s1] sm:$0xff]  ;;  %v487_v6 = vmov 0   ;;  %v230_v8 = vld [vmem:[%s603_s1 + $0x18] sm:$0xff]  ;;  %s434_s27 = sshll.u32 (%p538_p5), %s418_s15, 3 }
  0x21   : > { %461 = vset.pattern.permute.xlu1 %v487_v6  ;;  %460 = vset.pattern.permute.xlu0 %v487_v6  ;;  %v259_v7 = vld [vmem:[%s604_s2] sm:$0xff]  ;;  %v228_v9 = vld [vmem:[%s603_s1 + $0x8] sm:$0xff]  ;;  %v262_v11 = vld [vmem:[%s604_s2 + $0x18] sm:$0xff]  ;;  %s316_s30 = scalar_lea.vmem (%p538_p5), %s605_s3, %s434_s27 }
  0x22   : > { %243 = vperm.xlu1 %461, %v229_v4   ;;  %233 = vperm.xlu0 %460, %v227_v5   ;;  %v260_v10 = vld [vmem:[%s604_s2 + $0x8] sm:$0xff]  ;;  %v261_v12 = vld [vmem:[%s604_s2 + $0x10] sm:$0xff]  ;;  %v215_v13 = vld [vmem:[%s193_s26] sm:$0xff] }
  0x23   : > { %462 = vset.pattern.permute.xlu2 %v487_v6  ;;  %v219_v14 = vunpack.c.l.bf16 %v215_v13  ;;  %v220_v15 = vunpack.c.h.bf16 %v215_v13  ;;  %v216_v21 = vld [vmem:[%s193_s26 + $0x8] sm:$0xff]  ;;  %v217_v28 = vld [vmem:[%s193_s26 + $0x10] sm:$0xff]  ;;  %v218_v31 = vld [vmem:[%s193_s26 + $0x18] sm:$0xff] }
  0x24   : > { %265 = vperm.xlu2 %462, %v259_v7   ;;  %v221_v26 = vunpack.c.l.bf16 %v216_v21  ;;  %v222_v27 = vunpack.c.h.bf16 %v216_v21  ;;  %v223_v35 = vunpack.c.l.bf16 %v217_v28  ;;  %v224_v36 = vunpack.c.h.bf16 %v217_v28 }
  0x25   : > { %v225_v38 = vunpack.c.l.bf16 %v218_v31  ;;  %v226_v39 = vunpack.c.h.bf16 %v218_v31 }
  0x2a   : > { %248 = vperm.xlu1 %461, %v230_v8   ;;  %238 = vperm.xlu0 %460, %v228_v9  }
  0x2c   : > { %270 = vperm.xlu2 %462, %v260_v10  }
  0x32   : > { %280 = vperm.xlu1 %461, %v262_v11   ;;  %275 = vperm.xlu0 %460, %v261_v12  }
  0x7e   : > { %v266_v16 = vpop.permute.xlu2 %265 }
  0x86   : > { %v271_v37 = vpop.permute.xlu2 %270 }
  0x94   : > { %v244_v17 = vpop.permute.xlu1 %243  ;;  %v234_v18 = vpop.permute.xlu0 %233 }
  0x95   : > { %v251_v19 = vmul.f32 %v234_v18, %v219_v14  ;;  %v252_v20 = vmul.f32 %v234_v18, %v220_v15  ;;  %v255_v44 = vmul.f32 %v244_v17, %v223_v35  ;;  %v256_v45 = vmul.f32 %v244_v17, %v224_v36 }
  0x97   : > { %v283_v22 = vadd.f32 %v266_v16, %v251_v19  ;;  %v284_v23 = vadd.f32 %v266_v16, %v252_v20 }
  0x99   : > { %v291_v24 = vmax.f32 %v283_v22, 0.0  ;;  %v292_v25 = vmax.f32 %v284_v23, 0.0 }
  0x9b   : > { %v299_v29 = vpack.c.bf16 %v292_v25, %v291_v24 }
  0x9c   : > { %v249_v30 = vpop.permute.xlu1 %248  ;;  %v239_v32 = vpop.permute.xlu0 %238 }
  0x9d   : > { %303 = vst [vmem:[%s575_s12] sm:$0xff] %v299_v29  ;;  %v253_v33 = vmul.f32 %v239_v32, %v221_v26  ;;  %v254_v34 = vmul.f32 %v239_v32, %v222_v27  ;;  %v257_v46 = vmul.f32 %v249_v30, %v225_v38  ;;  %v258_v47 = vmul.f32 %v249_v30, %v226_v39 }
  0x9f   : > { %v285_v40 = vadd.f32 %v271_v37, %v253_v33  ;;  %v286_v41 = vadd.f32 %v271_v37, %v254_v34 }
  0xa1   : > { %v293_v42 = vmax.f32 %v285_v40, 0.0  ;;  %v294_v43 = vmax.f32 %v286_v41, 0.0 }
  0xa3   : > { %v300_v48 = vpack.c.bf16 %v294_v43, %v293_v42 }
  0xa4   : > { %v281_v49 = vpop.permute.xlu1 %280  ;;  %v276_v50 = vpop.permute.xlu0 %275  ;;  %v351_v61 = vld [vmem:[%s575_s12] sm:$0xff] (%p538_p5) }
  0xa5   : > { %304 = vst [vmem:[%s575_s12 + $0x8] sm:$0xff] %v300_v48  ;;  %v289_v51 = vadd.f32 %v281_v49, %v257_v46  ;;  %v290_v52 = vadd.f32 %v281_v49, %v258_v47  ;;  %v287_v53 = vadd.f32 %v276_v50, %v255_v44  ;;  %v288_v54 = vadd.f32 %v276_v50, %v256_v45 }
  0xa6   : > { %352 = vst [vmem:[%s316_s30] sm:$0xff] (%p538_p5), %v351_v61 }
  0xa7   : > { %v297_v55 = vmax.f32 %v289_v51, 0.0  ;;  %v298_v56 = vmax.f32 %v290_v52, 0.0  ;;  %v295_v57 = vmax.f32 %v287_v53, 0.0  ;;  %v296_v58 = vmax.f32 %v288_v54, 0.0 }
  0xa8   : > { %313 = sbr.rel (!%p538_p5) target bundleno = 181 (0xb5), region = 74 }
  0xa9   : > { %v302_v59 = vpack.c.bf16 %v298_v56, %v297_v55  ;;  %v301_v60 = vpack.c.bf16 %v296_v58, %v295_v57 }
  0xab   : > { %306 = vst [vmem:[%s575_s12 + $0x18] sm:$0xff] %v302_v59 }
  0xac   : > { %305 = vst [vmem:[%s575_s12 + $0x10] sm:$0xff] %v301_v60  ;;  %v353_v62 = vld [vmem:[%s575_s12 + $0x8] sm:$0xff] (%p538_p5) }
  0xad   : > { %354 = vst [vmem:[%s316_s30 + $0x10] sm:$0xff] %v353_v62 }
  0xb2   : > { %v357_v0 = vld [vmem:[%s575_s12 + $0x18] sm:$0xff] }
  0xb3   : > { %v355_v63 = vld [vmem:[%s575_s12 + $0x10] sm:$0xff]  ;;  %358 = vst [vmem:[%s316_s30 + $0x30] sm:$0xff] %v357_v0 }
  0xb4   : > { %356 = vst [vmem:[%s316_s30 + $0x20] sm:$0xff] %v355_v63 }
  0xb5 PF: > { %p10_p10 = scmp.ge.s32.totalorder %s525_s16, 4   ;;  %s607_s12 = smov %s481_s13 }
  0xb6   : > { %s608_s13 = smov %s536_s19  ;;  %s609_s14 = smov %s525_s16 }
  0xb7   :  { %12 = sbr.rel (!%p10_p10) target bundleno = 2 (0x2), region = 143 }

// kernel: decoder_layer_forward.2
= control target key start
LH: loop header
LB: loop body
LE: loop exit
PB: predicated region body
PF: predicated region fallthrough
CT: control target
= control target key end

     0   :  { %s725_s12 = smov 0   ;;  %s727_s13 = smov 0   ;;  %s845_s0 = inlined_call_operand.vmem [shape: bf16[36,512], index: 0, kind: input, shape index: {}]   ;;  %s846_s1 = inlined_call_operand.vmem [shape: bf16[32,36], index: 1, kind: input, shape index: {}]   ;;  %s847_s2 = inlined_call_operand.vmem [shape: bf16[32,512], index: 2, kind: output, shape index: {0}]   ;;  %s848_s3 = inlined_call_operand.vmem [shape: f32[2,64,128], index: 3, kind: output, shape index: {1}]  }
   0x1   :  { %s729_s14 = smov 0  }
   0x2 LB: > { %s741_s15 = sadd.s32 4294967295, %s702_s14   ;;  %s744_s16 = sadd.s32 1, %s702_s14   ;;  %s702_s14 = sphi %s729_s14, %s856_s14   ;;  %s698_s13 = sphi %s727_s13, %s855_s13   ;;  %s694_s12 = sphi %s725_s12, %s854_s12  }
   0x3   : > { %s18_s17 = ssub.s32 %s702_s14, %s744_s16  ;;  %s21_s18 = sadd.s32 1, %s698_s13 }
   0x4   : > { %p19_p0 = scmp.eq.s32.totalorder %s18_s17, 0  ;;  %p28_p1 = scmp.ne.s32.totalorder %s698_s13, %s694_s12 }
   0x5   : > { %p29_p2 = scmp.eq.s32.totalorder %s702_s14, 0  ;;  %p79_p3 = scmp.eq.s32.totalorder %s741_s15, 1 }
   0x6   : > { %s754_s19 = scalar_select %p19_p0, %s698_s13, %s21_s18  }
   0x7   : > { %p30_p4 = por %p29_p2, %p28_p1  ;;  %p756_p5 = por %p79_p3, %p28_p1 }
   0x8   : > { %p594_p6 = scmp.ge.s32.totalorder %s702_s14, 2 }
   0xa   : > { %130 = sbr.rel (%p594_p6) target bundleno = 24 (0x18), region = 20 }
   0xf   : > { %133 = sbr.rel (!%p30_p4) target bundleno = 24 (0x18), region = 24  ;;  %s135_s21 = sand.u32 (%p30_p4), 1, %s698_s13  }
  0x10   : > { %s635_s22 = sshll.u32 (%p30_p4), %s702_s14, 3  ;;  %s650_s23 = smul.u32 (%p30_p4), 40, %s135_s21 }
  0x11   : > { %s140_s26 = scalar_lea.vmem (%p30_p4), %s845_s0, %s635_s22 }
  0x12   : > { %v177_v0 = vld [vmem:[%s140_s26] sm:$0xff] (%p30_p4)  ;;  %v179_v1 = vld [vmem:[%s140_s26 + $0x10] sm:$0xff] (%p30_p4)  ;;  %s137_s27 = scalar_lea.vmem (%p30_p4), [#allocation2], %s650_s23 }
  0x13   : > { %v181_v2 = vld [vmem:[%s140_s26 + $0x20] sm:$0xff] (%p30_p4)  ;;  %178 = vst [vmem:[%s137_s27] sm:$0xff] (%p30_p4), %v177_v0  ;;  %v183_v3 = vld [vmem:[%s140_s26 + $0x30] sm:$0xff] (%p30_p4) }
  0x14   : > { %180 = vst [vmem:[%s137_s27 + $0x8] sm:$0xff] %v179_v1  ;;  %v185_v4 = vld [vmem:[%s140_s26 + $0x40] sm:$0xff] }
  0x15   : > { %182 = vst [vmem:[%s137_s27 + $0x10] sm:$0xff] %v181_v2 }
  0x16   : > { %184 = vst [vmem:[%s137_s27 + $0x18] sm:$0xff] %v183_v3 }
  0x17   : > { %186 = vst [vmem:[%s137_s27 + $0x20] sm:$0xff] %v185_v4 }
  0x18 PF: > { %p597_p7 = scmp.ge.s32.totalorder %s702_s14, 1  ;;  %p191_p8 = scmp.lt.s32.totalorder %s702_s14, 3 }
  0x1a   : > { %p192_p9 = pnand %p597_p7, %p191_p8 }
  0x1b   : > { %s198_s28 = sand.u32 (!%p192_p9), 1, %s694_s12   ;;  %s629_s10 = sshll.u32 (!%p192_p9), %s741_s15, 8 }
  0x1c   : > { %195 = sbr.rel (%p192_p9) target bundleno = 641 (0x281), region = 62  ;;  %s598_s8 = sshll.u32 (!%p192_p9), %s198_s28, 5 }
  0x1d   : > { %s651_s29 = smul.u32 (!%p192_p9), 40, %s198_s28  ;;  %s787_s9 = scalar_lea.vmem (!%p192_p9), [#allocation3], %s598_s8 }
  0x1e   : > { %s354_s11 = ssub.s32 (!%p192_p9), 512, %s629_s10  ;;  %p227_p11 = scmp.lt.s32.totalorder (!%p192_p9), %s741_s15, 1 }
  0x1f   : > { %s200_s30 = scalar_lea.vmem (!%p192_p9), [#allocation2], %s651_s29  ;;  %p355_p10 = scmp.lt.s32.totalorder (!%p192_p9), %s354_s11, 256 }
  0x21   : > { %v241_v5 = vld [vmem:[%s200_s30 + $0x20] sm:$0x33]  ;;  %vm284_vm0 = vcmask 1041408   ;;  %v619_v10 = vld [vmem:[%s200_s30 + $0x10] sm:$0xf]  ;;  %vm277_vm1 = vcmask 293888   ;;  %v357_v43 = vlaneseq }
  0x22   : > { %v265_v6 = vunpack.c.l.b16 %v241_v5  ;;  %v266_v7 = vunpack.c.h.b16 %v241_v5  ;;  %v642_v11 = vld [vmem:[%s200_s30 + $0x14] sm:$0xf0]  ;;  %v641_v12 = vld [vmem:[%s200_s30 + $0x14] sm:$0xf]  ;;  %v621_v13 = vld [vmem:[%s200_s30 + $0x18] sm:$0xf0] }
  0x23   : > { %v620_v16 = vor.u32 %v642_v11, %v619_v10  ;;  %v624_v17 = vor.u32 %v641_v12, %v621_v13  ;;  %v611_v18 = vld [vmem:[%s200_s30] sm:$0xf]  ;;  %v640_v19 = vld [vmem:[%s200_s30 + $0x4] sm:$0xf0]  ;;  %v639_v20 = vld [vmem:[%s200_s30 + $0x4] sm:$0xf] }
  0x24   : > { %v271_v8 = vpack.c.b16 %v265_v6, %v265_v6  ;;  %v272_v9 = vpack.c.b16 %v266_v7, %v266_v7  ;;  %v613_v21 = vld [vmem:[%s200_s30 + $0x8] sm:$0xf0]  ;;  %v612_v22 = vor.u32 %v640_v19, %v611_v18  ;;  %v637_v24 = vld [vmem:[%s846_s1] sm:$0xff]  ;;  %v704_v26 = vmov 0   ;;  %s858_s11 = smov (!%p355_p10, %s354_s11), 256  ;;  %s643_s22 = sshll.u32 (%p756_p5), %s741_s15, 3 }
  0x25   : > { %v616_v23 = vor.u32 %v639_v20, %v613_v21  ;;  %v638_v25 = vld [vmem:[%s846_s1 + $0x8] sm:$0xff]  ;;  %677 = vset.pattern.permute.xlu2 %v704_v26  ;;  %679 = vset.pattern.permute.xlu1 %v704_v26  ;;  %v358_v45 = vand.u32 127, %v357_v43  ;;  %v360_v49 = vstv %s858_s11  ;;  %s228_s12 = scalar_select %p227_p11, %s741_s15, 1 }
  0x26   : > { %v286_v14 = vsel %vm284_vm0, %v271_v8, 0  ;;  %v289_v15 = vsel %vm284_vm0, %v272_v9, 0  ;;  %678 = vset.pattern.permute.xlu0 %v704_v26  ;;  %s461_s25 = scalar_lea.vmem (%p756_p5), %s847_s2, %s643_s22 }
  0x27   : > { %296 = vmatpush.bf16.msra.mxu0 %v286_v14  ;;  %644 = vmatpush.bf16.msra.mxu2 %v286_v14  ;;  %v359_v47 = vadd.s32 128, %v358_v45  ;;  %vm794_vm2 = vcmp.lt.s32.totalorder %v358_v45, %v360_v49  ;;  %s636_s14 = sshll.u32 %s228_s12, 6 }
  0x28   : > { %315 = vmatpush.bf16.msra.mxu1 %v289_v15  ;;  %647 = vmatpush.bf16.msra.mxu3 %v289_v15  ;;  %s231_s21 = scalar_lea.vmem %s848_s3, %s636_s14 }
  0x29   : > { %vm798_vm3 = vcmp.lt.s32.totalorder %v359_v47, %v360_v49 }
  0x2b   : > { %297 = vmatpush.bf16.msra.mxu0 %v620_v16  ;;  %645 = vmatpush.bf16.msra.mxu2 %v620_v16 }
  0x2c   : > { %316 = vmatpush.bf16.msra.mxu1 %v624_v17  ;;  %648 = vmatpush.bf16.msra.mxu3 %v624_v17 }
  0x2f   : > { %298 = vmatpush.bf16.msra.mxu0 %v612_v22  ;;  %646 = vmatpush.bf16.msra.mxu2 %v612_v22 }
  0x30   : > { %317 = vmatpush.bf16.msra.mxu1 %v616_v23  ;;  %649 = vmatpush.bf16.msra.mxu3 %v616_v23 }
  0x32   : > { %625 = vmatmul.msk.bf16.vlgmr.msra.gmra.mxu0 %vm277_vm1, %v637_v24  ;;  %626 = vmatmul.msk.bf16.vlgmr.msra.gmra.mxu2 %vm277_vm1, %v638_v25 }
  0x33   : > { %627 = vmatmul.msk.bf16.vlgmr.msra.gmra.mxu1 %vm277_vm1, %v637_v24  ;;  %628 = vmatmul.msk.bf16.vlgmr.msra.gmra.mxu3 %vm277_vm1, %v638_v25 }
  0xaf   : > { %v779_v27 = vpop.f32.mrf.mxu0 }
  0xb0   : > { %v781_v28 = vpop.f32.mrf.mxu1 }
  0xb1   : > { %v329_v29 = vpack.c.bf16 %v781_v28, %v779_v27  ;;  %v337_v30 = vadd.f32 %v781_v28, %v779_v27 }
  0xb3   : > { %333 = vst [vmem:[%s787_s9] sm:$0xff] %v329_v29  ;;  %338 = vadd.xlane.f32.xlu0 %v337_v30 }
  0xb5   : > { %v305_v31 = vpop.f32.mrf.mxu2 }
  0xb6   : > { %v324_v32 = vpop.f32.mrf.mxu3 }
  0xb7   : > { %v331_v33 = vpack.c.bf16 %v324_v32, %v305_v31  ;;  %v302_v34 = vpop.f32.mrf.mxu0  ;;  %v343_v35 = vadd.f32 %v324_v32, %v305_v31 }
  0xb8   : > { %v321_v36 = vpop.f32.mrf.mxu1 }
  0xb9   : > { %335 = vst [vmem:[%s787_s9 + $0x10] sm:$0xff] %v331_v33  ;;  %v330_v37 = vpack.c.bf16 %v321_v36, %v302_v34  ;;  %344 = vadd.xlane.f32.xlu1 %v343_v35  ;;  %v340_v38 = vadd.f32 %v321_v36, %v302_v34 }
  0xba   : > { %v496_v33 = vld [vmem:[%s787_s9] sm:$0xff] (%p756_p5) }
  0xbb   : > { %334 = vst [vmem:[%s787_s9 + $0x8] sm:$0xff] %v330_v37  ;;  %341 = vadd.xlane.f32.xlu0 %v340_v38 }
  0xbc   : > { %497 = vst [vmem:[%s461_s25] sm:$0xff] (%p756_p5), %v496_v33 }
  0xbd   : > { %v307_v39 = vpop.f32.mrf.mxu2 }
  0xbe   : > { %v326_v40 = vpop.f32.mrf.mxu3 }
  0xbf   : > { %v332_v41 = vpack.c.bf16 %v326_v40, %v307_v39  ;;  %v346_v42 = vadd.f32 %v326_v40, %v307_v39 }
  0xc0   : > { %v500_v35 = vld [vmem:[%s787_s9 + $0x10] sm:$0xff] (%p756_p5) }
  0xc1   : > { %336 = vst [vmem:[%s787_s9 + $0x18] sm:$0xff] %v332_v41  ;;  %347 = vadd.xlane.f32.xlu1 %v346_v42 }
  0xc2   : > { %501 = vst [vmem:[%s461_s25 + $0x20] sm:$0xff] (%p756_p5), %v500_v35 }
 0x126   : > { %v339_v44 = vpop.xlane.xlu0 %338 }
 0x127   : > { %401 = vperm.xlu2 %677, %v339_v44   ;;  %v349_v4 = vmul.f32 0.00390625, %v339_v44 }
 0x129   : > { %v363_v5 = vsub.f32 %v779_v27, %v349_v4  ;;  %v364_v6 = vsub.f32 %v781_v28, %v349_v4 }
 0x12b   : > { %v371_v9 = vsel %vm794_vm2, %v363_v5, 0.0  ;;  %v372_v10 = vsel %vm798_vm3, %v364_v6, 0.0 }
 0x12c   : > { %v345_v46 = vpop.xlane.xlu1 %344  ;;  %v379_v13 = vmul.f32 %v371_v9, %v371_v9  ;;  %v380_v14 = vmul.f32 %v372_v10, %v372_v10 }
 0x12d   : > { %v351_v48 = vmul.f32 0.00390625, %v345_v46  ;;  %411 = vperm.xlu1 %679, %v345_v46  }
 0x12e   : > { %v342_v50 = vpop.xlane.xlu0 %341  ;;  %v387_v15 = vadd.f32 %v380_v14, %v379_v13 }
 0x12f   : > { %v367_v51 = vsub.f32 %v305_v31, %v351_v48  ;;  %v368_v52 = vsub.f32 %v324_v32, %v351_v48  ;;  %v350_v53 = vmul.f32 0.00390625, %v342_v50 }
 0x131   : > { %v365_v56 = vsub.f32 %v302_v34, %v350_v53  ;;  %v366_v57 = vsub.f32 %v321_v36, %v350_v53  ;;  %v375_v58 = vsel %vm794_vm2, %v367_v51, 0.0  ;;  %v376_v59 = vsel %vm798_vm3, %v368_v52, 0.0  ;;  %v498_v34 = vld [vmem:[%s787_s9 + $0x8] sm:$0xff] (%p756_p5)  ;;  %v502_v36 = vld [vmem:[%s787_s9 + $0x18] sm:$0xff] (%p756_p5) }
 0x132   : > { %v383_v60 = vmul.f32 %v375_v58, %v375_v58  ;;  %v384_v61 = vmul.f32 %v376_v59, %v376_v59  ;;  %499 = vst [vmem:[%s461_s25 + $0x10] sm:$0xff] (%p756_p5), %v498_v34 }
 0x133   : > { %v373_v62 = vsel %vm794_vm2, %v365_v56, 0.0  ;;  %v374_v63 = vsel %vm798_vm3, %v366_v57, 0.0  ;;  %503 = vst [vmem:[%s461_s25 + $0x30] sm:$0xff] (%p756_p5), %v502_v36 }
 0x134   : > { %v393_v0 = vadd.f32 %v384_v61, %v383_v60  ;;  %v381_v1 = vmul.f32 %v373_v62, %v373_v62  ;;  %v382_v2 = vmul.f32 %v374_v63, %v374_v63  ;;  %v348_v7 = vpop.xlane.xlu1 %347 }
 0x135   : > { %v352_v8 = vmul.f32 0.00390625, %v348_v7 }
 0x136   : > { %394 = vadd.xlane.f32.xlu0 %v393_v0  ;;  %v390_v3 = vadd.f32 %v382_v2, %v381_v1 }
 0x137   : > { %v369_v11 = vsub.f32 %v307_v39, %v352_v8  ;;  %v370_v12 = vsub.f32 %v326_v40, %v352_v8 }
 0x139   : > { %v377_v16 = vsel %vm794_vm2, %v369_v11, 0.0  ;;  %v378_v17 = vsel %vm798_vm3, %v370_v12, 0.0 }
 0x13a   : > { %v385_v18 = vmul.f32 %v377_v16, %v377_v16  ;;  %v386_v19 = vmul.f32 %v378_v17, %v378_v17 }
 0x13c   : > { %v396_v20 = vadd.f32 %v386_v19, %v385_v18 }
 0x14a   : > { %406 = vperm.xlu0 %678, %v342_v50  }
 0x150   : > { %388 = vadd.xlane.f32.xlu2 %v387_v15 }
 0x157   : > { %397 = vadd.xlane.f32.xlu1 %v396_v20 }
 0x168   : > { %416 = vperm.xlu2 %677, %v348_v7  }
 0x181   : > { %v402_v21 = vpop.permute.xlu2 %401 }
 0x182   : > { %439 = vst [vmem:[%s231_s21] sm:$0xff] %v402_v21 }
 0x191   : > { %391 = vadd.xlane.f32.xlu2 %v390_v3 }
 0x19f   : > { %v412_v22 = vpop.permute.xlu1 %411 }
 0x1a0   : > { %441 = vst [vmem:[%s231_s21 + $0x10] sm:$0xff] %v412_v22 }
 0x1a9   : > { %v395_v23 = vpop.xlane.xlu0 %394 }
 0x1bc   : > { %v407_v24 = vpop.permute.xlu0 %406 }
 0x1bd   : > { %440 = vst [vmem:[%s231_s21 + $0x8] sm:$0xff] %v407_v24 }
 0x1c3   : > { %v389_v25 = vpop.xlane.xlu2 %388 }
 0x1c4   : > { %421 = vperm.xlu2 %677, %v389_v25  }
 0x1ca   : > { %v398_v28 = vpop.xlane.xlu1 %397 }
 0x1cb   : > { %v417_v26 = vpop.permute.xlu2 %416 }
 0x1cc   : > { %442 = vst [vmem:[%s231_s21 + $0x18] sm:$0xff] %v417_v26  ;;  %431 = vperm.xlu2 %677, %v395_v23  }
 0x204   : > { %v392_v27 = vpop.xlane.xlu2 %391 }
 0x205   : > { %426 = vperm.xlu1 %679, %v392_v27  }
 0x20d   : > { %436 = vperm.xlu1 %679, %v398_v28  }
 0x21e   : > { %v422_v29 = vpop.permute.xlu2 %421 }
 0x21f   : > { %443 = vst [vmem:[%s231_s21 + $0x20] sm:$0xff] %v422_v29 }
 0x226   : > { %v432_v30 = vpop.permute.xlu2 %431 }
 0x227   : > { %445 = vst [vmem:[%s231_s21 + $0x30] sm:$0xff] %v432_v30 }
 0x277   : > { %v427_v31 = vpop.permute.xlu1 %426 }
 0x278   : > { %444 = vst [vmem:[%s231_s21 + $0x28] sm:$0xff] %v427_v31 }
 0x27c   : > { %458 = sbr.rel (!%p756_p5) target bundleno = 641 (0x281), region = 70 }
 0x27f   : > { %v437_v32 = vpop.permute.xlu1 %436 }
 0x280   : > { %446 = vst [vmem:[%s231_s21 + $0x38] sm:$0xff] %v437_v32 }
 0x281 PF: > { %p11_p12 = scmp.ge.s32.totalorder %s744_s16, 4   ;;  %s854_s12 = smov %s698_s13 }
 0x282   : > { %s855_s13 = smov %s754_s19  ;;  %s856_s14 = smov %s744_s16 }
 0x283   :  { %13 = sbr.rel (!%p11_p12) target bundleno = 2 (0x2), region = 151 }

</bundles_post_ra>
